<compile_context>
chip_gen: v5e
topology: v5e:2x2
jax: 0.10.0
libtpu: 0.0.40
codegen_flags: <defaults>
</compile_context>

<pallas_src>
import functools

import numpy as np
import jax
import jax.numpy as jnp
from jax.experimental import pallas as pl
from jax.experimental.pallas import tpu as pltpu


def _round_up(x, m):
    return ((x + m - 1) // m) * m


def couple_istft_kernel(mag_ref, cph_ref, sph_ref, cw_ref, inv_env_ref,
                        out_ref, x_ref, acc_ref, *,
                        n_fft, hop, n_frames, f_pad, out_width):
    # mag_ref/cph_ref/sph_ref : (T, F_pad)        zero-padded freq bins
    # cw_ref                  : (2*F_pad, n_fft)  fused [Cr; Ci] with hann folded in
    # inv_env_ref             : (1, L_pad)        1 / window^2 OLA envelope (0 on pad)
    # out_ref                 : (1, L_pad)        lane-dense padded output block
    # x_ref                   : (T, 2*F_pad)      scratch: fused [real | imag] MXU operand
    # acc_ref                 : (1, L_acc)        scratch: overlap-add line (acc coords)
    mag = mag_ref[...]

    # Assemble [real | imag] with lane-tile-aligned stores (f_pad % 128 == 0).
    x_ref[:, :f_pad] = mag * cph_ref[...]
    x_ref[:, f_pad:] = mag * sph_ref[...]

    # Fused per-frame inverse real-DFT + synthesis windowing on the MXU:
    # (T, 2*F_pad) @ (2*F_pad, n_fft) -> (T, n_fft)
    frames = jnp.dot(x_ref[...], cw_ref[...],
                     preferred_element_type=jnp.float32)

    # Direct overlap-add: frame t lands at acc[t*hop : t*hop + n_fft].
    # Offsets are static (unrolled), so these are plain VPU slice-adds.
    acc_ref[...] = jnp.zeros_like(acc_ref)
    for t in range(n_frames):
        s = t * hop
        acc_ref[:, s:s + n_fft] = acc_ref[:, s:s + n_fft] + frames[t:t + 1, :]

    # center=True trim (n_fft//2) + window-square normalization, one lane-dense store.
    half = n_fft // 2
    out_ref[...] = acc_ref[:, half:half + out_width] * inv_env_ref[...]


def _make_istft_constants(fft_size, shift_size, win_length, n_frames):
    """Precompute (numpy, static shapes) the fused DFT/window matrix and envelope."""
    N = fft_size
    F = N // 2 + 1
    hop = shift_size
    F_pad = _round_up(F, 128)

    # inverse real-DFT: x[n] = sum_k Re(X_k)*cr[k]*cos(theta) - Im(X_k)*ci[k]*sin(theta)
    n = np.arange(N)
    k = np.arange(F)
    ang = 2.0 * np.pi * np.outer(k, n) / N
    dc_or_nyq = (k == 0) | (k == N // 2)
    cr_scale = np.where(dc_or_nyq, 1.0, 2.0) / N
    ci_scale = np.where(dc_or_nyq, 0.0, 2.0) / N
    Cr = cr_scale[:, None] * np.cos(ang)                  # (F, N)
    Ci = -ci_scale[:, None] * np.sin(ang)                 # (F, N)

    # torch.hann_window(win_length) (periodic), zero-padded to n_fft, centered
    w = 0.5 - 0.5 * np.cos(2.0 * np.pi * np.arange(win_length) / win_length)
    lpad = (N - win_length) // 2
    win_full = np.zeros(N, dtype=np.float64)
    win_full[lpad:lpad + win_length] = w

    # fused [Cr; Ci] with the synthesis window folded in; zero rows in the
    # lane-padding ranges so padded bins contribute nothing.
    Cw = np.zeros((2 * F_pad, N), dtype=np.float64)
    Cw[:F] = Cr * win_full[None, :]
    Cw[F_pad:F_pad + F] = Ci * win_full[None, :]

    L_out = hop * (n_frames - 1)                 # torch.istft default output length
    L_pad = max(128, _round_up(L_out, 128))      # lane-dense output block
    half = N // 2
    L_acc = max((n_frames - 1) * hop + N, half + L_pad)

    # window-square OLA envelope (torch.istft normalization)
    env_acc = np.zeros(L_acc, dtype=np.float64)
    for t in range(n_frames):
        env_acc[t * hop:t * hop + N] += win_full ** 2
    env = env_acc[half:half + L_pad]
    inv_env = np.zeros(L_pad, dtype=np.float64)
    valid = env[:L_out] > 1e-11
    # TODO(synk): torch.istft raises on NOLA violations; zero-envelope samples emitted as 0 here.
    inv_env[:L_out][valid] = 1.0 / env[:L_out][valid]

    return (jnp.asarray(Cw, jnp.float32),
            jnp.asarray(inv_env[None, :], jnp.float32),
            F_pad, L_out, L_pad, L_acc)


def couple_forward(mag, phase, *, fft_size, shift_size, win_length):
    """mag, phase: (B, 1, F, T) with F = fft_size//2 + 1.  Returns (B, hop*(T-1))."""
    B, C, F, T = mag.shape
    assert C == 1 and F == fft_size // 2 + 1
    N = fft_size

    Cw, inv_env, F_pad, L_out, L_pad, L_acc = _make_istft_constants(
        fft_size, shift_size, win_length, T)

    # Single fused XLA prologue: NCHW-style (B,1,F,T) -> (B,T,F_pad) layout,
    # f32 cast, lane-padding of the bin axis, and the cos/sin tables.
    # TODO(synk): move cos/sin in-kernel once Mosaic sin/cos lowering is confirmed
    # on the target toolchain; kept in the prologue for lowering robustness.
    mag_btf = jnp.transpose(mag[:, 0], (0, 2, 1)).astype(jnp.float32)
    ph_btf = jnp.transpose(phase[:, 0], (0, 2, 1)).astype(jnp.float32)
    cph = jnp.cos(ph_btf)
    sph = jnp.sin(ph_btf)
    if F_pad != F:
        pad = ((0, 0), (0, 0), (0, F_pad - F))
        mag_btf = jnp.pad(mag_btf, pad)      # zero mag => padded bins contribute 0
        cph = jnp.pad(cph, pad)
        sph = jnp.pad(sph, pad)

    kernel = functools.partial(
        couple_istft_kernel,
        n_fft=N, hop=shift_size, n_frames=T, f_pad=F_pad, out_width=L_pad)

    out = pl.pallas_call(
        kernel,
        out_shape=jax.ShapeDtypeStruct((B, 1, L_pad), jnp.float32),
        grid=(B,),
        in_specs=[
            pl.BlockSpec((None, T, F_pad), lambda b: (b, 0, 0)),   # mag
            pl.BlockSpec((None, T, F_pad), lambda b: (b, 0, 0)),   # cos(phase)
            pl.BlockSpec((None, T, F_pad), lambda b: (b, 0, 0)),   # sin(phase)
            pl.BlockSpec((2 * F_pad, N), lambda b: (0, 0)),        # fused DFT+window
            pl.BlockSpec((1, L_pad), lambda b: (0, 0)),            # 1/envelope
        ],
        out_specs=pl.BlockSpec((None, 1, L_pad), lambda b: (b, 0, 0)),
        scratch_shapes=[
            pltpu.VMEM((T, 2 * F_pad), jnp.float32),   # fused [real|imag] operand
            pltpu.VMEM((1, L_acc), jnp.float32),       # overlap-add line
        ],
        compiler_params=pltpu.CompilerParams(
            dimension_semantics=("parallel",)),
    )(mag_btf, cph, sph, Cw, inv_env)

    return out[:, 0, :L_out]


def _reference_istft_np(mag, phase, fft_size, hop, win_length):
    """Independent float64 numpy reference of torch.istft(mag*exp(i*phase))."""
    mag = np.asarray(mag, np.float64)
    phase = np.asarray(phase, np.float64)
    B, _, F, T = mag.shape
    N = fft_size
    spec = mag[:, 0] * np.exp(1j * phase[:, 0])          # (B, F, T)
    # C2R transform ignores the imaginary part at DC / Nyquist; make it explicit.
    spec[:, 0, :] = spec[:, 0, :].real
    if N % 2 == 0:
        spec[:, -1, :] = spec[:, -1, :].real
    frames = np.fft.irfft(spec, n=N, axis=1)             # (B, N, T)

    w = 0.5 - 0.5 * np.cos(2.0 * np.pi * np.arange(win_length) / win_length)
    win = np.zeros(N, dtype=np.float64)
    lpad = (N - win_length) // 2
    win[lpad:lpad + win_length] = w
    frames = frames * win[None, :, None]

    L_full = N + hop * (T - 1)
    L_out = hop * (T - 1)
    half = N // 2
    y = np.zeros((B, L_full), dtype=np.float64)
    env = np.zeros(L_full, dtype=np.float64)
    for t in range(T):
        y[:, t * hop:t * hop + N] += frames[:, :, t]
        env[t * hop:t * hop + N] += win ** 2
    return y[:, half:half + L_out] / env[None, half:half + L_out]


if __name__ == "__main__":
    # small shapes consistent with the module (scaled-down STFT config)
    B = 2
    fft_size, shift_size, win_length = 64, 16, 48
    F = fft_size // 2 + 1     # 33 frequency bins
    T = 8                     # frames ("chunk_size")

    key = jax.random.PRNGKey(0)
    k1, k2 = jax.random.split(key)
    mag = jax.random.uniform(k1, (B, 1, F, T), dtype=jnp.float32)
    phase = jax.random.uniform(k2, (B, 1, F, T), dtype=jnp.float32,
                               minval=-np.pi, maxval=np.pi)

    fwd = jax.jit(functools.partial(
        couple_forward, fft_size=fft_size, shift_size=shift_size,
        win_length=win_length))
    y = jax.block_until_ready(fwd(mag, phase))

    assert y.shape == (B, shift_size * (T - 1)), y.shape
    assert bool(jnp.all(jnp.isfinite(y)))

    y_ref = _reference_istft_np(mag, phase, fft_size, shift_size, win_length)
    np.testing.assert_allclose(np.asarray(y), y_ref, rtol=5e-3, atol=5e-3)

    print("KERNEL_OK")
</pallas_src>

<mosaic_0001>
module attributes {stable_mosaic.version = 11 : i64} {
  func.func @couple_istft_kernel(%arg0: i32, %arg1: memref<1x8x128xf32, #tpu.memory_space<vmem>>, %arg2: memref<1x8x128xf32, #tpu.memory_space<vmem>>, %arg3: memref<1x8x128xf32, #tpu.memory_space<vmem>>, %arg4: memref<256x64xf32, #tpu.memory_space<vmem>>, %arg5: memref<1x128xf32, #tpu.memory_space<vmem>>, %arg6: memref<1x1x128xf32, #tpu.memory_space<vmem>>, %arg7: memref<8x256xf32, #tpu.memory_space<vmem>>, %arg8: memref<1x176xf32, #tpu.memory_space<vmem>>) attributes {dimension_semantics = [#tpu.dimension_semantics<parallel>], iteration_bounds = array<i64: 2>, scalar_prefetch = 0 : i64, scratch_operands = 2 : i64, tpu.core_type = #tpu.core_type<tc>, window_params = [{transform_indices = @transform_0, window_bounds = array<i64: 1, 8, 128>}, {transform_indices = @transform_1, window_bounds = array<i64: 1, 8, 128>}, {transform_indices = @transform_2, window_bounds = array<i64: 1, 8, 128>}, {pipeline_mode = #tpu.pipeline_mode<synchronous>, transform_indices = @transform_3, window_bounds = array<i64: 256, 64>}, {pipeline_mode = #tpu.pipeline_mode<synchronous>, transform_indices = @transform_4, window_bounds = array<i64: 1, 128>}, {transform_indices = @transform_5, window_bounds = array<i64: 1, 1, 128>}]} {
    %c0 = arith.constant 0 : index
    %c0_0 = arith.constant 0 : index
    %c0_1 = arith.constant 0 : index
    %0 = vector.load %arg1[%c0, %c0_0, %c0_1] : memref<1x8x128xf32, #tpu.memory_space<vmem>>, vector<1x8x128xf32>
    %1 = vector.shape_cast %0 : vector<1x8x128xf32> to vector<8x128xf32>
    %c0_2 = arith.constant 0 : index
    %c0_3 = arith.constant 0 : index
    %c0_4 = arith.constant 0 : index
    %2 = vector.load %arg2[%c0_2, %c0_3, %c0_4] : memref<1x8x128xf32, #tpu.memory_space<vmem>>, vector<1x8x128xf32>
    %3 = vector.shape_cast %2 : vector<1x8x128xf32> to vector<8x128xf32>
    %4 = arith.mulf %1, %3 : vector<8x128xf32>
    %c0_5 = arith.constant 0 : index
    %c0_6 = arith.constant 0 : index
    %5 = vector.load %arg7[%c0_5, %c0_6] : memref<8x256xf32, #tpu.memory_space<vmem>>, vector<8x128xf32>
    tpu.vector_store %arg7[%c0_5, %c0_6], %4 {strides = array<i32>} : memref<8x256xf32, #tpu.memory_space<vmem>>, vector<8x128xf32>,
    %c0_7 = arith.constant 0 : index
    %c0_8 = arith.constant 0 : index
    %c0_9 = arith.constant 0 : index
    %6 = vector.load %arg3[%c0_7, %c0_8, %c0_9] : memref<1x8x128xf32, #tpu.memory_space<vmem>>, vector<1x8x128xf32>
    %7 = vector.shape_cast %6 : vector<1x8x128xf32> to vector<8x128xf32>
    %8 = arith.mulf %1, %7 : vector<8x128xf32>
    %c0_10 = arith.constant 0 : index
    %c128 = arith.constant 128 : index
    %9 = vector.load %arg7[%c0_10, %c128] : memref<8x256xf32, #tpu.memory_space<vmem>>, vector<8x128xf32>
    tpu.vector_store %arg7[%c0_10, %c128], %8 {strides = array<i32>} : memref<8x256xf32, #tpu.memory_space<vmem>>, vector<8x128xf32>,
    %c0_11 = arith.constant 0 : index
    %c0_12 = arith.constant 0 : index
    %10 = vector.load %arg7[%c0_11, %c0_12] : memref<8x256xf32, #tpu.memory_space<vmem>>, vector<8x256xf32>
    %c0_13 = arith.constant 0 : index
    %c0_14 = arith.constant 0 : index
    %11 = vector.load %arg4[%c0_13, %c0_14] : memref<256x64xf32, #tpu.memory_space<vmem>>, vector<256x64xf32>
    %cst = arith.constant dense<0.000000e+00> : vector<8x64xf32>
    %12 = tpu.matmul %10, %11, %cst {dimension_numbers = #tpu.dot_dimension_numbers<[1], [0], [0], [1], [0, 0, 1, 1], [], []>} : vector<8x256xf32>, vector<256x64xf32>, vector<8x64xf32> -> vector<8x64xf32>
    %cst_15 = arith.constant 0.000000e+00 : f32
    %13 = vector.broadcast %cst_15 : f32 to vector<1x176xf32>
    %c0_16 = arith.constant 0 : index
    %c0_17 = arith.constant 0 : index
    %14 = vector.load %arg8[%c0_16, %c0_17] : memref<1x176xf32, #tpu.memory_space<vmem>>, vector<1x176xf32>
    tpu.vector_store %arg8[%c0_16, %c0_17], %13 {strides = array<i32>} : memref<1x176xf32, #tpu.memory_space<vmem>>, vector<1x176xf32>,
    %c0_18 = arith.constant 0 : index
    %c0_19 = arith.constant 0 : index
    %15 = vector.load %arg8[%c0_18, %c0_19] : memref<1x176xf32, #tpu.memory_space<vmem>>, vector<1x64xf32>
    %16 = vector.extract_strided_slice %12 {offsets = [0, 0], sizes = [1, 64], strides = [1, 1]} : vector<8x64xf32> to vector<1x64xf32>
    %17 = arith.addf %15, %16 : vector<1x64xf32>
    %c0_20 = arith.constant 0 : index
    %c0_21 = arith.constant 0 : index
    %18 = vector.load %arg8[%c0_20, %c0_21] : memref<1x176xf32, #tpu.memory_space<vmem>>, vector<1x64xf32>
    tpu.vector_store %arg8[%c0_20, %c0_21], %17 {strides = array<i32>} : memref<1x176xf32, #tpu.memory_space<vmem>>, vector<1x64xf32>,
    %c0_22 = arith.constant 0 : index
    %c16 = arith.constant 16 : index
    %19 = vector.load %arg8[%c0_22, %c16] : memref<1x176xf32, #tpu.memory_space<vmem>>, vector<1x64xf32>
    %20 = vector.extract_strided_slice %12 {offsets = [1, 0], sizes = [1, 64], strides = [1, 1]} : vector<8x64xf32> to vector<1x64xf32>
    %21 = arith.addf %19, %20 : vector<1x64xf32>
    %c0_23 = arith.constant 0 : index
    %c16_24 = arith.constant 16 : index
    %22 = vector.load %arg8[%c0_23, %c16_24] : memref<1x176xf32, #tpu.memory_space<vmem>>, vector<1x64xf32>
    tpu.vector_store %arg8[%c0_23, %c16_24], %21 {strides = array<i32>} : memref<1x176xf32, #tpu.memory_space<vmem>>, vector<1x64xf32>,
    %c0_25 = arith.constant 0 : index
    %c32 = arith.constant 32 : index
    %23 = vector.load %arg8[%c0_25, %c32] : memref<1x176xf32, #tpu.memory_space<vmem>>, vector<1x64xf32>
    %24 = vector.extract_strided_slice %12 {offsets = [2, 0], sizes = [1, 64], strides = [1, 1]} : vector<8x64xf32> to vector<1x64xf32>
    %25 = arith.addf %23, %24 : vector<1x64xf32>
    %c0_26 = arith.constant 0 : index
    %c32_27 = arith.constant 32 : index
    %26 = vector.load %arg8[%c0_26, %c32_27] : memref<1x176xf32, #tpu.memory_space<vmem>>, vector<1x64xf32>
    tpu.vector_store %arg8[%c0_26, %c32_27], %25 {strides = array<i32>} : memref<1x176xf32, #tpu.memory_space<vmem>>, vector<1x64xf32>,
    %c0_28 = arith.constant 0 : index
    %c48 = arith.constant 48 : index
    %27 = vector.load %arg8[%c0_28, %c48] : memref<1x176xf32, #tpu.memory_space<vmem>>, vector<1x64xf32>
    %28 = vector.extract_strided_slice %12 {offsets = [3, 0], sizes = [1, 64], strides = [1, 1]} : vector<8x64xf32> to vector<1x64xf32>
    %29 = arith.addf %27, %28 : vector<1x64xf32>
    %c0_29 = arith.constant 0 : index
    %c48_30 = arith.constant 48 : index
    %30 = vector.load %arg8[%c0_29, %c48_30] : memref<1x176xf32, #tpu.memory_space<vmem>>, vector<1x64xf32>
    tpu.vector_store %arg8[%c0_29, %c48_30], %29 {strides = array<i32>} : memref<1x176xf32, #tpu.memory_space<vmem>>, vector<1x64xf32>,
    %c0_31 = arith.constant 0 : index
    %c64 = arith.constant 64 : index
    %31 = vector.load %arg8[%c0_31, %c64] : memref<1x176xf32, #tpu.memory_space<vmem>>, vector<1x64xf32>
    %32 = vector.extract_strided_slice %12 {offsets = [4, 0], sizes = [1, 64], strides = [1, 1]} : vector<8x64xf32> to vector<1x64xf32>
    %33 = arith.addf %31, %32 : vector<1x64xf32>
    %c0_32 = arith.constant 0 : index
    %c64_33 = arith.constant 64 : index
    %34 = vector.load %arg8[%c0_32, %c64_33] : memref<1x176xf32, #tpu.memory_space<vmem>>, vector<1x64xf32>
    tpu.vector_store %arg8[%c0_32, %c64_33], %33 {strides = array<i32>} : memref<1x176xf32, #tpu.memory_space<vmem>>, vector<1x64xf32>,
    %c0_34 = arith.constant 0 : index
    %c80 = arith.constant 80 : index
    %35 = vector.load %arg8[%c0_34, %c80] : memref<1x176xf32, #tpu.memory_space<vmem>>, vector<1x64xf32>
    %36 = vector.extract_strided_slice %12 {offsets = [5, 0], sizes = [1, 64], strides = [1, 1]} : vector<8x64xf32> to vector<1x64xf32>
    %37 = arith.addf %35, %36 : vector<1x64xf32>
    %c0_35 = arith.constant 0 : index
    %c80_36 = arith.constant 80 : index
    %38 = vector.load %arg8[%c0_35, %c80_36] : memref<1x176xf32, #tpu.memory_space<vmem>>, vector<1x64xf32>
    tpu.vector_store %arg8[%c0_35, %c80_36], %37 {strides = array<i32>} : memref<1x176xf32, #tpu.memory_space<vmem>>, vector<1x64xf32>,
    %c0_37 = arith.constant 0 : index
    %c96 = arith.constant 96 : index
    %39 = vector.load %arg8[%c0_37, %c96] : memref<1x176xf32, #tpu.memory_space<vmem>>, vector<1x64xf32>
    %40 = vector.extract_strided_slice %12 {offsets = [6, 0], sizes = [1, 64], strides = [1, 1]} : vector<8x64xf32> to vector<1x64xf32>
    %41 = arith.addf %39, %40 : vector<1x64xf32>
    %c0_38 = arith.constant 0 : index
    %c96_39 = arith.constant 96 : index
    %42 = vector.load %arg8[%c0_38, %c96_39] : memref<1x176xf32, #tpu.memory_space<vmem>>, vector<1x64xf32>
    tpu.vector_store %arg8[%c0_38, %c96_39], %41 {strides = array<i32>} : memref<1x176xf32, #tpu.memory_space<vmem>>, vector<1x64xf32>,
    %c0_40 = arith.constant 0 : index
    %c112 = arith.constant 112 : index
    %43 = vector.load %arg8[%c0_40, %c112] : memref<1x176xf32, #tpu.memory_space<vmem>>, vector<1x64xf32>
    %44 = vector.extract_strided_slice %12 {offsets = [7, 0], sizes = [1, 64], strides = [1, 1]} : vector<8x64xf32> to vector<1x64xf32>
    %45 = arith.addf %43, %44 : vector<1x64xf32>
    %c0_41 = arith.constant 0 : index
    %c112_42 = arith.constant 112 : index
    %46 = vector.load %arg8[%c0_41, %c112_42] : memref<1x176xf32, #tpu.memory_space<vmem>>, vector<1x64xf32>
    tpu.vector_store %arg8[%c0_41, %c112_42], %45 {strides = array<i32>} : memref<1x176xf32, #tpu.memory_space<vmem>>, vector<1x64xf32>,
    %c0_43 = arith.constant 0 : index
    %c32_44 = arith.constant 32 : index
    %47 = vector.load %arg8[%c0_43, %c32_44] : memref<1x176xf32, #tpu.memory_space<vmem>>, vector<1x128xf32>
    %c0_45 = arith.constant 0 : index
    %c0_46 = arith.constant 0 : index
    %48 = vector.load %arg5[%c0_45, %c0_46] : memref<1x128xf32, #tpu.memory_space<vmem>>, vector<1x128xf32>
    %49 = arith.mulf %47, %48 : vector<1x128xf32>
    %c0_47 = arith.constant 0 : index
    %c0_48 = arith.constant 0 : index
    %c0_49 = arith.constant 0 : index
    %50 = vector.load %arg6[%c0_47, %c0_48, %c0_49] : memref<1x1x128xf32, #tpu.memory_space<vmem>>, vector<1x1x128xf32>
    %51 = vector.shape_cast %50 : vector<1x1x128xf32> to vector<1x128xf32>
    %52 = vector.shape_cast %49 : vector<1x128xf32> to vector<1x1x128xf32>
    tpu.vector_store %arg6[%c0_47, %c0_48, %c0_49], %52 {strides = array<i32>} : memref<1x1x128xf32, #tpu.memory_space<vmem>>, vector<1x1x128xf32>,
    return
  }
  func.func @transform_0(%arg0: i32) -> (i32, i32, i32) {
    %c0_i32 = arith.constant 0 : i32
    %c0_i32_0 = arith.constant 0 : i32
    %c0_i32_1 = arith.constant 0 : i32
    return %arg0, %c0_i32, %c0_i32_0 : i32, i32, i32
  }
  func.func @transform_1(%arg0: i32) -> (i32, i32, i32) {
    %c0_i32 = arith.constant 0 : i32
    %c0_i32_0 = arith.constant 0 : i32
    %c0_i32_1 = arith.constant 0 : i32
    return %arg0, %c0_i32, %c0_i32_0 : i32, i32, i32
  }
  func.func @transform_2(%arg0: i32) -> (i32, i32, i32) {
    %c0_i32 = arith.constant 0 : i32
    %c0_i32_0 = arith.constant 0 : i32
    %c0_i32_1 = arith.constant 0 : i32
    return %arg0, %c0_i32, %c0_i32_0 : i32, i32, i32
  }
  func.func @transform_3(%arg0: i32) -> (i32, i32) {
    %c0_i32 = arith.constant 0 : i32
    %c0_i32_0 = arith.constant 0 : i32
    %c0_i32_1 = arith.constant 0 : i32
    return %c0_i32, %c0_i32_0 : i32, i32
  }
  func.func @transform_4(%arg0: i32) -> (i32, i32) {
    %c0_i32 = arith.constant 0 : i32
    %c0_i32_0 = arith.constant 0 : i32
    %c0_i32_1 = arith.constant 0 : i32
    return %c0_i32, %c0_i32_0 : i32, i32
  }
  func.func @transform_5(%arg0: i32) -> (i32, i32, i32) {
    %c0_i32 = arith.constant 0 : i32
    %c0_i32_0 = arith.constant 0 : i32
    %c0_i32_1 = arith.constant 0 : i32
    return %arg0, %c0_i32, %c0_i32_0 : i32, i32, i32
  }
}

</mosaic_0001>

<bundles_post_ra>
// kernel: couple_forward.1
= control target key start
LH: loop header
LB: loop body
LE: loop exit
PB: predicated region body
PF: predicated region fallthrough
CT: control target
= control target key end

     0   :  { %10 = vsyncpa [#allocation5], 0  ;;  %s920_s0 = inlined_call_operand.vmem [shape: f32[2,8,128], index: 0, kind: input, shape index: {}]   ;;  %s921_s1 = inlined_call_operand.vmem [shape: f32[2,8,128], index: 1, kind: input, shape index: {}]   ;;  %s922_s2 = inlined_call_operand.vmem [shape: f32[2,8,128], index: 2, kind: input, shape index: {}]   ;;  %s923_s3 = inlined_call_operand.hbm [shape: f32[256,64], index: 3, kind: input, shape index: {}]   ;;  %s924_s4 = inlined_call_operand.vmem [shape: f32[1,128], index: 4, kind: input, shape index: {}]   ;;  %s925_s5 = inlined_call_operand.hbm [shape: f32[2,1,128], index: 5, kind: output, shape index: {}]  }
   0x1   :  { %11 = vsyncpa [#allocation6], 0 }
   0x2   :  { %13 = vsyncpa [#allocation6 + $0x1], 0  ;;  %s788_s18 = smov 0   ;;  %s790_s19 = smov 0  }
   0x3   :  { %s792_s20 = smov 0   ;;  %s794_s21 = smov 0  }
   0x4 LB: > { %s809_s22 = sadd.s32 4294967295, %s745_s21   ;;  %s578_s23 = sadd.s32 4294967294, %s745_s21   ;;  %s745_s21 = sphi %s794_s21, %s933_s21   ;;  %s741_s20 = sphi %s792_s20, %s932_s20   ;;  %s737_s19 = sphi %s790_s19, %s931_s19   ;;  %s733_s18 = sphi %s788_s18, %s930_s18  }
   0x5   : > { %s813_s24 = sadd.s32 1, %s745_s21   ;;  %s146_s25 = sadd.s32 1, %s741_s20 }
   0x6   : > { %s143_s26 = ssub.s32 %s745_s21, %s813_s24  ;;  %p156_p0 = scmp.ne.s32.totalorder %s741_s20, %s737_s19 }
   0x7   : > { %p144_p1 = scmp.eq.s32.totalorder %s143_s26, 0  ;;  %p157_p2 = scmp.eq.s32.totalorder %s809_s22, 1 }
   0x8   : > { %p162_p3 = scmp.ne.s32.totalorder %s737_s19, %s733_s18  ;;  %p163_p4 = scmp.eq.s32.totalorder %s578_s23, 1 }
   0x9   : > { %s824_s27 = scalar_select %p144_p1, %s741_s20, %s146_s25  }
   0xa   : > { %p826_p5 = por %p157_p2, %p156_p0  ;;  %p830_p6 = por %p163_p4, %p162_p3 }
   0xb   : > { %p579_p7 = scmp.ge.s32.totalorder %s745_s21, 1  ;;  %p170_p8 = scmp.lt.s32.totalorder %s745_s21, 3 }
   0xc   : > { %p603_p9 = scmp.eq.s32.totalorder %s809_s22, 0  ;;  %s181_s7 = sshll.u32 %s923_s3, 4  ;;  %s182_s7 = int_to_ptr.hbm [resolvable:$true] %s181_s7 }
   0xd   : > { %p171_p10 = pnand %p579_p7, %p170_p8  ;;  %s747_s8 = smov [#allocation4]  }
   0xe   : > { %s183_s9 = sshll.u32 %s747_s8, 4  ;;  %s748_s10 = smov 128   ;;  %s184_s9 = int_to_ptr.vmem [resolvable:$true] %s183_s9 }
   0xf   : > { %p595_p11 = pneg %p171_p10  ;;  %s749_s11 = smov 8  }
  0x10   : > { %223 = sbr.rel (%p171_p10) target bundleno = 499 (0x1f3), region = 40 }
  0x11   : > { %p596_p12 = pnand %p603_p9, %p595_p11 }
  0x13   : > { %598 = dma.hbm_to_vmem [thread:$0]  (!%p596_p12), %s182_s7, 4096, %s184_s9, [#allocation5], %s748_s10, %s748_s10, %s749_s11  }
  0x15   : > { %724 = dma.done.wait (%p603_p9), [#allocation5], 4096  }
  0x16   : > { %726 = vsyncadd (%p603_p9), [#allocation5], 4294963200  ;;  %v294_v0 = vld [vmem:[#allocation4 + $0x78] sm:$0xff]  ;;  %v293_v2 = vld [vmem:[#allocation4 + $0x70] sm:$0xff]  ;;  %p258_p13 = scmp.lt.s32.totalorder %s809_s22, 1  ;;  %v351_v37 = vlaneseq  ;;  %v750_v39 = vmov 0.0  }
  0x17   : > { %v310_v1 = vld [vmem:[#allocation4 + $0xf8] sm:$0xff]  ;;  %311 = vmatpush.msra.mxu0 %v294_v0  ;;  %v309_v3 = vld [vmem:[#allocation4 + $0xf0] sm:$0xff]  ;;  %v292_v4 = vld [vmem:[#allocation4 + $0x68] sm:$0xff]  ;;  %s751_s7 = smov 16   ;;  %s752_s8 = smov 32   ;;  %vm417_vm14 = vcmask 654336  }
  0x18   : > { %331 = vmatpush.msra.mxu1 %v310_v1  ;;  %v308_v5 = vld [vmem:[#allocation4 + $0xe8] sm:$0xff]  ;;  %v291_v6 = vld [vmem:[#allocation4 + $0x60] sm:$0xff]  ;;  %v290_v8 = vld [vmem:[#allocation4 + $0x58] sm:$0xff]  ;;  %s259_s12 = scalar_select %p258_p13, %s809_s22, 1  ;;  %vm858_vm0 = vcmp.lt.s32.totalorder %v351_v37, 176  ;;  %vm358_vm1 = vcmp.lt.s32.totalorder %v351_v37, 64 }
  0x19   : > { %312 = vmatpush.msra.mxu0 %v293_v2  ;;  %v307_v7 = vld [vmem:[#allocation4 + $0xe0] sm:$0xff]  ;;  %v306_v9 = vld [vmem:[#allocation4 + $0xd8] sm:$0xff]  ;;  %v289_v10 = vld [vmem:[#allocation4 + $0x50] sm:$0xff]  ;;  %355 = vst.msk [vmem:[#allocation3] sm:$0x3] %vm858_vm0, %v750_v39  ;;  %s753_s9 = smov 48  }
  0x1a   : > { %332 = vmatpush.msra.mxu1 %v309_v3  ;;  %v305_v11 = vld [vmem:[#allocation4 + $0xd0] sm:$0xff]  ;;  %v288_v12 = vld [vmem:[#allocation4 + $0x48] sm:$0xff]  ;;  %v287_v14 = vld [vmem:[#allocation4 + $0x40] sm:$0xff]  ;;  %s584_s13 = sshll.u32 %s259_s12, 3  ;;  %s754_s10 = smov 64   ;;  %vm370_vm2 = vcmp.ge.s32.totalorder %v351_v37, 16 }
  0x1b   : > { %313 = vmatpush.msra.mxu0 %v292_v4  ;;  %v304_v13 = vld [vmem:[#allocation4 + $0xc8] sm:$0xff]  ;;  %v303_v15 = vld [vmem:[#allocation4 + $0xc0] sm:$0xff]  ;;  %v286_v16 = vld [vmem:[#allocation4 + $0x38] sm:$0xff]  ;;  %s261_s16 = scalar_lea.vmem %s920_s0, %s584_s13  ;;  %s265_s25 = scalar_lea.vmem %s921_s1, %s584_s13  ;;  %vm371_vm3 = vcmp.lt.s32.totalorder %v351_v37, 80  ;;  %vm382_vm5 = vcmp.ge.s32.totalorder %v351_v37, 32  ;;  %vm383_vm6 = vcmp.lt.s32.totalorder %v351_v37, 96 }
  0x1c   : > { %333 = vmatpush.msra.mxu1 %v308_v5  ;;  %v302_v17 = vld [vmem:[#allocation4 + $0xb8] sm:$0xff]  ;;  %v285_v18 = vld [vmem:[#allocation4 + $0x30] sm:$0xff]  ;;  %v284_v20 = vld [vmem:[#allocation4 + $0x28] sm:$0xff]  ;;  %s269_s6 = scalar_lea.vmem %s922_s2, %s584_s13  ;;  %s755_s13 = smov 80   ;;  %vm394_vm8 = vcmp.ge.s32.totalorder %v351_v37, 48  ;;  %vm395_vm9 = vcmp.lt.s32.totalorder %v351_v37, 112 }
  0x1d   : > { %314 = vmatpush.msra.mxu0 %v291_v6  ;;  %v301_v19 = vld [vmem:[#allocation4 + $0xb0] sm:$0xff]  ;;  %v300_v21 = vld [vmem:[#allocation4 + $0xa8] sm:$0xff]  ;;  %v283_v22 = vld [vmem:[#allocation4 + $0x20] sm:$0xff]  ;;  %s756_s14 = smov 96   ;;  %s757_s15 = smov 112   ;;  %vm406_vm11 = vcmp.ge.s32.totalorder %v351_v37, 64 }
  0x1e   : > { %334 = vmatpush.msra.mxu1 %v307_v7  ;;  %v299_v23 = vld [vmem:[#allocation4 + $0xa0] sm:$0xff]  ;;  %v282_v24 = vld [vmem:[#allocation4 + $0x18] sm:$0xff]  ;;  %v281_v26 = vld [vmem:[#allocation4 + $0x10] sm:$0xff]  ;;  %vm407_vm12 = vcmp.lt.s32.totalorder %v351_v37, 128  ;;  %vm421_vm15 = vcmp.ge.s32.totalorder %v351_v37, 80  ;;  %s699_s11 = scalar_lea.hbm %s925_s5, 2 }
  0x1f   : > { %315 = vmatpush.msra.mxu0 %v290_v8  ;;  %v298_v25 = vld [vmem:[#allocation4 + $0x98] sm:$0xff]  ;;  %v297_v27 = vld [vmem:[#allocation4 + $0x90] sm:$0xff]  ;;  %v280_v31 = vld [vmem:[#allocation4 + $0x8] sm:$0xff] }
  0x20   : > { %335 = vmatpush.msra.mxu1 %v306_v9  ;;  %v270_v28 = vld [vmem:[%s261_s16] sm:$0xff]  ;;  %v296_v32 = vld [vmem:[#allocation4 + $0x88] sm:$0xff]  ;;  %v279_v33 = vld [vmem:[#allocation4] sm:$0xff]  ;;  %s256_s16 = sand.u32 1, %s737_s19  }
  0x21   : > { %316 = vmatpush.msra.mxu0 %v289_v10  ;;  %v271_v29 = vld [vmem:[%s265_s25] sm:$0xff]  ;;  %v295_v34 = vld [vmem:[#allocation4 + $0x80] sm:$0xff]  ;;  %v356_v42 = vld [vmem:[#allocation3] sm:$0x1]  ;;  %s483_s25 = scalar_lea.hbm %s925_s5, %s809_s22  ;;  %s257_s26 = scalar_lea.vmem [#allocation7], %s256_s16 }
  0x22   : > { %336 = vmatpush.msra.mxu1 %v305_v11  ;;  %v274_v30 = vld [vmem:[%s269_s6] sm:$0xff]  ;;  %v272_v35 = vmul.f32 %v271_v29, %v270_v28  ;;  %vm372_vm4 = vmand %vm370_vm2, %vm371_vm3  ;;  %vm432_vm3 = vcmask 785408   ;;  %s485_s30 = sshll.u32 %s257_s26, 4  ;;  %s487_s6 = sshll.u32 %s483_s25, 4  ;;  %s486_s30 = int_to_ptr.vmem [resolvable:$true] %s485_s30  ;;  %s488_s6 = int_to_ptr.hbm [resolvable:$true] %s487_s6 }
  0x23   : > { %317 = vmatpush.msra.mxu0 %v288_v12  ;;  %v275_v36 = vmul.f32 %v274_v30, %v270_v28  ;;  %v455_v49 = vld [vmem:[%s924_s4] sm:$0x1]  ;;  %vm384_vm7 = vmand %vm382_vm5, %vm383_vm6  ;;  %vm437_vm5 = vcmp.lt.s32.totalorder %v351_v37, 160 }
  0x24   : > { %337 = vmatpush.msra.mxu1 %v304_v13  ;;  %vm396_vm10 = vmand %vm394_vm8, %vm395_vm9  ;;  %vm447_vm8 = vcmask 916480  }
  0x25   : > { %318 = vmatpush.msra.mxu0 %v287_v14  ;;  %vm408_vm13 = vmand %vm406_vm11, %vm407_vm12 }
  0x26   : > { %338 = vmatpush.msra.mxu1 %v303_v15 }
  0x27   : > { %319 = vmatpush.msra.mxu0 %v286_v16 }
  0x28   : > { %339 = vmatpush.msra.mxu1 %v302_v17 }
  0x29   : > { %320 = vmatpush.msra.mxu0 %v285_v18 }
  0x2a   : > { %340 = vmatpush.msra.mxu1 %v301_v19 }
  0x2b   : > { %321 = vmatpush.msra.mxu0 %v284_v20 }
  0x2c   : > { %341 = vmatpush.msra.mxu1 %v300_v21 }
  0x2d   : > { %322 = vmatpush.msra.mxu0 %v283_v22 }
  0x2e   : > { %342 = vmatpush.msra.mxu1 %v299_v23 }
  0x2f   : > { %323 = vmatpush.msra.mxu0 %v282_v24 }
  0x30   : > { %343 = vmatpush.msra.mxu1 %v298_v25 }
  0x31   : > { %324 = vmatpush.msra.mxu0 %v281_v26 }
  0x32   : > { %344 = vmatpush.msra.mxu1 %v297_v27 }
  0x33   : > { %325 = vmatpush.msra.mxu0 %v280_v31 }
  0x34   : > { %345 = vmatpush.msra.mxu1 %v296_v32 }
  0x35   : > { %326 = vmatpush.msra.mxu0 %v279_v33 }
  0x36   : > { %346 = vmatpush.msra.mxu1 %v295_v34  ;;  %327 = vmatmul.f32.vlgmr.msra.gmra.mxu0 %v272_v35 }
  0x37   : > { %347 = vmatmul.f32.vlgmr.msra.gmra.mxu1 %v275_v36 }
  0xb3   : > { %v328_v40 = vpop.f32.mrf.mxu0 }
  0xb4   : > { %v348_v41 = vpop.f32.mrf.mxu1 }
  0xb5   : > { %v349_v43 = vadd.f32 %v348_v41, %v328_v40 }
  0xb7   : > { %v357_v44 = vadd.f32 %v356_v42, %v349_v43  ;;  %363 = vst [vmem:[#allocation1] sm:$0xff] %v349_v43 }
  0xb9   : > { %360 = vst.msk [vmem:[#allocation3] sm:$0x1] %vm358_vm1, %v357_v44  ;;  %vm422_vm1 = vcmp.lt.s32.totalorder %v351_v37, 144 }
  0xba   : > { %vm423_vm2 = vmand %vm421_vm15, %vm422_vm1 }
  0xbe   : > { %v365_v45 = vld [vmem:[#allocation1 + $0x1] ss:$9 sm:$0xff] }
  0xbf   : > { %366 = vrot.lane.b32.xlu0 %v365_v45, %s751_s7  ;;  %375 = vst [vmem:[#allocation1] sm:$0xff] %v349_v43  ;;  %s475_s7 = scalar_lea.sflag [#allocation6], %s256_s16 }
  0xc0   : > { %v361_v54 = vld [vmem:[#allocation3] sm:$0x1] }
  0xc6   : > { %v377_v46 = vld [vmem:[#allocation1 + $0x2] ss:$9 sm:$0xff] }
  0xc7   : > { %378 = vrot.lane.b32.xlu0 %v377_v46, %s752_s8  ;;  %387 = vst [vmem:[#allocation1] sm:$0xff] %v349_v43 }
  0xce   : > { %v389_v47 = vld [vmem:[#allocation1 + $0x3] ss:$9 sm:$0xff] }
  0xcf   : > { %390 = vrot.lane.b32.xlu1 %v389_v47, %s753_s9  ;;  %399 = vst [vmem:[#allocation1] sm:$0xff] %v349_v43 }
  0xd6   : > { %v401_v48 = vld [vmem:[#allocation1 + $0x4] ss:$9 sm:$0xff] }
  0xd7   : > { %402 = vrot.lane.b32.xlu1 %v401_v48, %s754_s10  ;;  %411 = vst [vmem:[#allocation1] sm:$0xff] %v349_v43 }
  0xde   : > { %v413_v50 = vld [vmem:[#allocation1 + $0x5] ss:$9 sm:$0xff] }
  0xdf   : > { %414 = vrot.lane.b32.xlu2 %v413_v50, %s755_s13  ;;  %426 = vst [vmem:[#allocation1] sm:$0xff] %v349_v43  ;;  %457 = vrot.lane.b32.xlu1 %v455_v49, %s752_s8  ;;  %s693_s8 = sshra.s32 %s488_s6, 4  ;;  %s694_s8 = int_to_ptr.hbm [resolvable:$true] %s693_s8 }
  0xe0   : > { %s695_s9 = scalar_lea.hbm %s694_s8, 1  ;;  %p700_p3 = scmp.lt.s32.totalorder %s694_s8, %s925_s5 }
  0xe1   : > { %p696_p0 = scmp.ne.s32.totalorder %s694_s8, %s695_s9  ;;  %p701_p4 = scmp.lt.s32.totalorder %s699_s11, %s695_s9 }
  0xe3   : > { %p697_p1 = pnand %p696_p0, %p826_p5  ;;  %p702_p7 = por %p701_p4, %p700_p3 }
  0xe5   : > { %p698_p2 = pneg %p697_p1 }
  0xe6   : > { %v428_v51 = vld [vmem:[#allocation1 + $0x6] ss:$9 sm:$0xff] }
  0xe7   : > { %429 = vrot.lane.b32.xlu2 %v428_v51, %s756_s14  ;;  %441 = vst [vmem:[#allocation1] sm:$0xff] %v349_v43  ;;  %p703_p8 = pnand %p702_p7, %p698_p2 }
  0xee   : > { %v443_v52 = vld [vmem:[#allocation1 + $0x7] ss:$9 sm:$0xff] }
  0xef   : > { %444 = vrot.lane.b32.xlu0 %v443_v52, %s757_s15 }
 0x131   : > { %v367_v53 = vpop.permute.xlu0 %366 }
 0x132   : > { %v369_v55 = vadd.f32 %v367_v53, %v361_v54 }
 0x134   : > { %373 = vst.msk [vmem:[#allocation3] sm:$0x1] %vm372_vm4, %v369_v55  ;;  %vm436_vm4 = vcmp.ge.s32.totalorder %v351_v37, 96 }
 0x135   : > { %vm438_vm6 = vmand %vm436_vm4, %vm437_vm5 }
 0x139   : > { %v379_v56 = vpop.permute.xlu0 %378  ;;  %v415_v1 = vpop.permute.xlu2 %414 }
 0x13a   : > { %v416_v2 = vrot.slane %v415_v1, 7 }
 0x13b   : > { %v374_v57 = vld [vmem:[#allocation3] sm:$0x1] }
 0x13c   : > { %v381_v58 = vadd.f32 %v379_v56, %v374_v57  ;;  %v418_v3 = vsel %vm417_vm14, %v416_v2, %v415_v1 }
 0x13e   : > { %385 = vst.msk [vmem:[#allocation3] sm:$0x1] %vm384_vm7, %v381_v58  ;;  %vm451_vm7 = vcmp.ge.s32.totalorder %v351_v37, 112 }
 0x13f   : > { %vm452_vm9 = vmand %vm451_vm7, %vm858_vm0 }
 0x141   : > { %v391_v59 = vpop.permute.xlu1 %390  ;;  %v430_v6 = vpop.permute.xlu2 %429 }
 0x142   : > { %v431_v7 = vrot.slane %v430_v6, 7 }
 0x144   : > { %v433_v8 = vsel %vm432_vm3, %v431_v7, %v430_v6 }
 0x145   : > { %v386_v60 = vld [vmem:[#allocation3] sm:$0x1] }
 0x146   : > { %v393_v61 = vadd.f32 %v391_v59, %v386_v60 }
 0x148   : > { %397 = vst.msk [vmem:[#allocation3] sm:$0x1] %vm396_vm10, %v393_v61  ;;  %vm460_vm10 = vcmask 261120  }
 0x149   : > { %v403_v62 = vpop.permute.xlu1 %402 }
 0x14f   : > { %v398_v63 = vld [vmem:[#allocation3] sm:$0x1] }
 0x150   : > { %v405_v0 = vadd.f32 %v403_v62, %v398_v63 }
 0x151   : > { %v458_v16 = vpop.permute.xlu1 %457 }
 0x152   : > { %409 = vst.msk [vmem:[#allocation3] sm:$0x1] %vm408_vm13, %v405_v0  ;;  %v459_v17 = vrot.slane %v458_v16, 7 }
 0x154   : > { %v461_v19 = vsel %vm460_vm10, %v459_v17, %v458_v16 }
 0x159   : > { %v410_v4 = vld [vmem:[#allocation3] sm:$0x3] }
 0x15a   : > { %v420_v5 = vadd.f32 %v418_v3, %v410_v4 }
 0x15c   : > { %424 = vst.msk [vmem:[#allocation3] sm:$0x3] %vm423_vm2, %v420_v5 }
 0x161   : > { %v445_v11 = vpop.permute.xlu0 %444 }
 0x162   : > { %v446_v12 = vrot.slane %v445_v11, 7 }
 0x163   : > { %v425_v9 = vld [vmem:[#allocation3] sm:$0x3] }
 0x164   : > { %v435_v10 = vadd.f32 %v433_v8, %v425_v9  ;;  %v448_v14 = vsel %vm447_vm8, %v446_v12, %v445_v11 }
 0x166   : > { %439 = vst.msk [vmem:[#allocation3] sm:$0x3] %vm438_vm6, %v435_v10 }
 0x16d   : > { %v440_v13 = vld [vmem:[#allocation3] sm:$0x3] }
 0x16e   : > { %v450_v15 = vadd.f32 %v448_v14, %v440_v13 }
 0x170   : > { %453 = vst.msk [vmem:[#allocation3] sm:$0x3] %vm452_vm9, %v450_v15 }
 0x177   : > { %v454_v18 = vld [vmem:[#allocation3] sm:$0x3] }
 0x178   : > { %v463_v20 = vmul.f32 %v461_v19, %v454_v18 }
 0x17a   : > { %v466_v21 = vperm.slane %v463_v20, 1  ;;  %v465_v22 = vperm.slane %v463_v20, 0 }
 0x17c   : > { %469 = vrot.lane.b32.xlu0 %v466_v21, %s756_s14  ;;  %467 = vrot.lane.b32.xlu2 %v465_v22, %s756_s14 }
 0x1d6   : > { %v468_v23 = vpop.permute.xlu2 %467 }
 0x1ee   : > { %v470_v24 = vpop.permute.xlu0 %469 }
 0x1ef   : > { %v471_v25 = vsel %vm432_vm3, %v468_v23, %v470_v24 }
 0x1f0   : > { %473 = vst [vmem:[%s257_s26] sm:$0x1] %v471_v25 }
 0x1f1   : > { %706 = shalt.err (!%p703_p8)
}
 0x1f2   : > { %593 = dma.vmem_to_hbm [thread:$0]  (%p826_p5), %s486_s30, 16, %s488_s6, %s475_s7  }
 0x1f3 PF: > { %p605_p9 = scmp.ge.s32.totalorder %s745_s21, 2  ;;  %s499_s14 = sand.u32 1, %s733_s18  }
 0x1f4   : > { %s500_s15 = scalar_lea.sflag [#allocation6], %s499_s14 }
 0x1f5   : > { %p600_p10 = pnand %p605_p9, %p830_p6 }
 0x1f7   : > { %p601_p11 = pneg %p600_p10 }
 0x1f9   : > { %728 = dma.done.wait (%p601_p11), %s500_s15, 16  }
 0x1fa   : > { %730 = vsyncadd (%p601_p11), %s500_s15, 4294967280  ;;  %p16_p12 = scmp.ge.s32.totalorder %s813_s24, 4   ;;  %s930_s18 = smov %s737_s19 }
 0x1fb   : > { %s931_s19 = smov %s741_s20  ;;  %s932_s20 = smov %s824_s27 }
 0x1fc   : > { %s933_s21 = smov %s813_s24  ;;  %18 = sbr.rel (!%p16_p12) target bundleno = 4 (0x4), region = 93 }
 0x201   :  { %505 = vsyncpa [#allocation5], 1 }
 0x202   :  { %507 = vsyncpa [#allocation5 + $0x1], 1 }
 0x203   :  { %508 = vsyncpa [#allocation6], 1 }
 0x204   :  { %510 = vsyncpa [#allocation6 + $0x1], 1 }

</bundles_post_ra>
